<compile_context>
chip_gen: v7x
topology: tpu7x:2x2x1
jax: 0.10.0
libtpu: 0.0.40
codegen_flags: <defaults>
</compile_context>

<pallas_src>
import jax
import jax.numpy as jnp
from jax.experimental import pallas as pl
from jax.experimental.pallas import tpu as pltpu


def _wbce_kernel(logits_ref, target_ref, w_ref, loss_ref):
    # logits_ref / target_ref: (C, LT)   w_ref / loss_ref: (1, LT)
    x = logits_ref[...].astype(jnp.float32)
    t = target_ref[...].astype(jnp.float32)

    # Stable binary cross entropy with logits (torch formulation), elementwise.
    # VPU does the max/mul/sub, EUP handles exp/log1p (separate bundle slot).
    elem = jnp.maximum(x, 0.0) - x * t + jnp.log1p(jnp.exp(-jnp.abs(x)))

    # Mean over classes = short sublane-axis reduction (depth C), stays lane-dense.
    mean_c = jnp.mean(elem, axis=0, keepdims=True)  # (1, LT)

    w = w_ref[...].astype(jnp.float32)
    loss_ref[...] = (mean_c * w).astype(loss_ref.dtype)


def weighted_binary_cross_entropy_loss(logits, target, weights, *, lane_tile=8192):
    """logits/target: (B, A, C) float, weights: (B, A) float -> loss (B, A) float32."""
    B, A, C = logits.shape
    N = B * A

    # Lane tile: large (amortize per-step overhead), multiple of 128, never larger
    # than the (128-padded) row count.
    lane_tile = min(lane_tile, pl.cdiv(N, 128) * 128)
    n_pad = pl.cdiv(N, lane_tile) * lane_tile

    # Rows-on-lanes layout: (C, N). Wrapper-side transpose is layout plumbing that
    # buys dense vregs + unmasked stores inside the kernel.
    logits2 = logits.reshape(N, C).T            # (C, N)
    target2 = target.reshape(N, C).T            # (C, N)
    weights2 = weights.reshape(1, N)            # (1, N)

    if n_pad != N:
        pad = n_pad - N
        logits2 = jnp.pad(logits2, ((0, 0), (0, pad)))
        target2 = jnp.pad(target2, ((0, 0), (0, pad)))
        weights2 = jnp.pad(weights2, ((0, 0), (0, pad)))  # zero weight => zero loss

    grid = (n_pad // lane_tile,)

    loss2 = pl.pallas_call(
        _wbce_kernel,
        out_shape=jax.ShapeDtypeStruct((1, n_pad), jnp.float32),
        grid_spec=pltpu.PrefetchScalarGridSpec(
            num_scalar_prefetch=0,
            grid=grid,
            in_specs=[
                pl.BlockSpec((C, lane_tile), lambda i: (0, i)),
                pl.BlockSpec((C, lane_tile), lambda i: (0, i)),
                pl.BlockSpec((1, lane_tile), lambda i: (0, i)),
            ],
            out_specs=pl.BlockSpec((1, lane_tile), lambda i: (0, i)),
        ),
        compiler_params=pltpu.CompilerParams(
            dimension_semantics=("parallel",),
        ),
    )(logits2, target2, weights2)

    return loss2[0, :N].reshape(B, A)


def _reference(logits, target, weights):
    # pure-JAX reference matching torch F.binary_cross_entropy_with_logits semantics
    x = logits.astype(jnp.float32)
    t = target.astype(jnp.float32)
    elem = jnp.maximum(x, 0.0) - x * t + jnp.log1p(jnp.exp(-jnp.abs(x)))
    return elem.mean(axis=-1) * weights.astype(jnp.float32)


if __name__ == "__main__":
    key = jax.random.PRNGKey(0)
    B, A, C = 2, 64, 8  # batch=2, anchors=64, classes=8 -> N = 128 rows

    k1, k2, k3 = jax.random.split(key, 3)
    logits = jax.random.normal(k1, (B, A, C), dtype=jnp.float32)
    cls_idx = jax.random.randint(k2, (B, A), 0, C)
    target = jax.nn.one_hot(cls_idx, C, dtype=jnp.float32)
    weights = jax.random.uniform(k3, (B, A), dtype=jnp.float32)

    loss = weighted_binary_cross_entropy_loss(logits, target, weights)
    loss = jax.block_until_ready(loss)

    ref = _reference(logits, target, weights)
    assert loss.shape == (B, A)
    assert jnp.allclose(loss, ref, atol=1e-5, rtol=1e-5), "mismatch vs reference"

    print("KERNEL_OK")
</pallas_src>

<mosaic_0001>
module attributes {stable_mosaic.version = 11 : i64} {
  func.func @_wbce_kernel(%arg0: i32, %arg1: memref<8x128xf32, #tpu.memory_space<vmem>>, %arg2: memref<8x128xf32, #tpu.memory_space<vmem>>, %arg3: memref<1x128xf32, #tpu.memory_space<vmem>>, %arg4: memref<1x128xf32, #tpu.memory_space<vmem>>) attributes {dimension_semantics = [#tpu.dimension_semantics<parallel>], iteration_bounds = array<i64: 1>, scalar_prefetch = 0 : i64, scratch_operands = 0 : i64, tpu.core_type = #tpu.core_type<tc>, window_params = [{transform_indices = @transform_0, window_bounds = array<i64: 8, 128>}, {transform_indices = @transform_1, window_bounds = array<i64: 8, 128>}, {transform_indices = @transform_2, window_bounds = array<i64: 1, 128>}, {transform_indices = @transform_3, window_bounds = array<i64: 1, 128>}]} {
    %c0 = arith.constant 0 : index
    %c0_0 = arith.constant 0 : index
    %0 = vector.load %arg1[%c0, %c0_0] : memref<8x128xf32, #tpu.memory_space<vmem>>, vector<8x128xf32>
    %c0_1 = arith.constant 0 : index
    %c0_2 = arith.constant 0 : index
    %1 = vector.load %arg2[%c0_1, %c0_2] : memref<8x128xf32, #tpu.memory_space<vmem>>, vector<8x128xf32>
    %cst = arith.constant 0.000000e+00 : f32
    %2 = vector.broadcast %cst : f32 to vector<8x128xf32>
    %3 = arith.maximumf %0, %2 : vector<8x128xf32>
    %4 = arith.mulf %0, %1 : vector<8x128xf32>
    %5 = arith.subf %3, %4 : vector<8x128xf32>
    %6 = math.absf %0 : vector<8x128xf32>
    %cst_3 = arith.constant 0.000000e+00 : f32
    %7 = vector.broadcast %cst_3 : f32 to vector<8x128xf32>
    %8 = arith.subf %7, %6 : vector<8x128xf32>
    %9 = math.exp %8 : vector<8x128xf32>
    %10 = math.log1p %9 : vector<8x128xf32>
    %11 = arith.addf %5, %10 : vector<8x128xf32>
    %cst_4 = arith.constant dense<0.000000e+00> : vector<128xf32>
    %12 = vector.multi_reduction <add>, %11, %cst_4 [0] : vector<8x128xf32> to vector<128xf32>
    %13 = vector.shape_cast %12 : vector<128xf32> to vector<1x128xf32>
    %cst_5 = arith.constant 8.000000e+00 : f32
    %14 = vector.broadcast %cst_5 : f32 to vector<1x128xf32>
    %15 = arith.divf %13, %14 : vector<1x128xf32>
    %c0_6 = arith.constant 0 : index
    %c0_7 = arith.constant 0 : index
    %16 = vector.load %arg3[%c0_6, %c0_7] : memref<1x128xf32, #tpu.memory_space<vmem>>, vector<1x128xf32>
    %17 = arith.mulf %15, %16 : vector<1x128xf32>
    %c0_8 = arith.constant 0 : index
    %c0_9 = arith.constant 0 : index
    %18 = vector.load %arg4[%c0_8, %c0_9] : memref<1x128xf32, #tpu.memory_space<vmem>>, vector<1x128xf32>
    tpu.vector_store %arg4[%c0_8, %c0_9], %17 {strides = array<i32>} : memref<1x128xf32, #tpu.memory_space<vmem>>, vector<1x128xf32>,
    return
  }
  func.func @transform_0(%arg0: i32) -> (i32, i32) {
    %c0_i32 = arith.constant 0 : i32
    %c0_i32_0 = arith.constant 0 : i32
    return %c0_i32, %arg0 : i32, i32
  }
  func.func @transform_1(%arg0: i32) -> (i32, i32) {
    %c0_i32 = arith.constant 0 : i32
    %c0_i32_0 = arith.constant 0 : i32
    return %c0_i32, %arg0 : i32, i32
  }
  func.func @transform_2(%arg0: i32) -> (i32, i32) {
    %c0_i32 = arith.constant 0 : i32
    %c0_i32_0 = arith.constant 0 : i32
    return %c0_i32, %arg0 : i32, i32
  }
  func.func @transform_3(%arg0: i32) -> (i32, i32) {
    %c0_i32 = arith.constant 0 : i32
    %c0_i32_0 = arith.constant 0 : i32
    return %c0_i32, %arg0 : i32, i32
  }
}

</mosaic_0001>

<bundles_post_ra>
// kernel: tpu_custom_call.1
= control target key start
LH: loop header
LB: loop body
LE: loop exit
PB: predicated region body
PF: predicated region fallthrough
CT: control target
= control target key end

     0   :  { %8 = vsyncpa [#allocation3], 0  ;;  %s226_s0 = inlined_call_operand.hbm [shape: f32[8,128], index: 0, kind: input, shape index: {}]   ;;  %s227_s1 = inlined_call_operand.hbm [shape: f32[8,128], index: 1, kind: input, shape index: {}]   ;;  %s228_s2 = inlined_call_operand.vmem [shape: f32[1,128], index: 2, kind: input, shape index: {}]   ;;  %s229_s3 = inlined_call_operand.hbm [shape: f32[1,128], index: 3, kind: output, shape index: {}]  }
   0x1   :  { %9 = vsyncpa [#allocation6], 0 }
   0x2   :  { %10 = vsyncpa [#allocation4], 0  ;;  %s164_s12 = smov [#allocation2]   ;;  %s165_s14 = smov [#allocation5]  }
   0x3   :  { %s17_s13 = sshll.u32 %s164_s12, 4  ;;  %s27_s15 = sshll.u32 %s165_s14, 4  ;;  %s18_s13 = int_to_ptr.vmem [resolvable:$true] %s17_s13  ;;  %s28_s15 = int_to_ptr.vmem [resolvable:$true] %s27_s15 }
   0x4   :  { %s92_s18 = scalar_lea.hbm %s226_s0, 128 }
   0x5   :  { %p93_p0 = scmp.ne.s32.totalorder %s226_s0, %s92_s18  ;;  %p96_p1 = scmp.lt.u32.totalorder %s92_s18, %s226_s0 }
   0x7   :  { %p98_p2 = pnand %p96_p1, %p93_p0 }
   0x9   :  { %101 = shalt.err (!%p98_p2)
}
   0xa   :  { %s102_s23 = scalar_lea.vmem %s18_s13, 128  ;;  %p107_p4 = scmp.lt.s32.totalorder %s18_s13, %s18_s13 }
   0xb   :  { %p103_p3 = scmp.ne.s32.totalorder %s18_s13, %s102_s23  ;;  %p108_p5 = scmp.lt.s32.totalorder %s102_s23, %s102_s23 }
   0xd   :  { %p109_p6 = por %p108_p5, %p107_p4 }
   0xf   :  { %p110_p7 = pnand %p109_p6, %p103_p3 }
  0x11   :  { %113 = shalt.err (!%p110_p7)
}
  0x12   :  { %20 = dma.hbm_to_vmem [thread:$0]  %s226_s0, 128, %s18_s13, [#allocation3]  }
  0x13   :  { %s114_s28 = scalar_lea.hbm %s227_s1, 128 }
  0x14   :  { %p115_p8 = scmp.ne.s32.totalorder %s227_s1, %s114_s28  ;;  %p118_p9 = scmp.lt.u32.totalorder %s114_s28, %s227_s1 }
  0x16   :  { %p120_p10 = pnand %p118_p9, %p115_p8 }
  0x18   :  { %123 = shalt.err (!%p120_p10)
}
  0x19   :  { %s124_s6 = scalar_lea.vmem %s28_s15, 128  ;;  %p129_p12 = scmp.lt.s32.totalorder %s28_s15, %s28_s15 }
  0x1a   :  { %p125_p11 = scmp.ne.s32.totalorder %s28_s15, %s124_s6  ;;  %p130_p13 = scmp.lt.s32.totalorder %s124_s6, %s124_s6 }
  0x1c   :  { %p131_p0 = por %p130_p13, %p129_p12 }
  0x1e   :  { %p132_p1 = pnand %p131_p0, %p125_p11 }
  0x20   :  { %135 = shalt.err (!%p132_p1)
}
  0x21   :  { %30 = dma.hbm_to_vmem [thread:$0]  %s227_s1, 128, %s28_s15, [#allocation6]  }
  0x22   :  { %158 = dma.done.wait [#allocation3], 128  }
  0x23   :  { %159 = vsyncadd [#allocation3], 4294967168 }
  0x24   :  { %160 = dma.done.wait [#allocation6], 128  }
  0x25   :  { %161 = vsyncadd [#allocation6], 4294967168  ;;  %v39_v0 = vld [vmem:[#allocation2] sm:$0xff]  ;;  %v40_v7 = vld [vmem:[#allocation5] sm:$0xff]  ;;  %s166_s9 = smov [#allocation7]  }
  0x26   :  { %v44_v1 = vand.u32 2147483647, %v39_v0  ;;  %v41_v9 = vmax.f32 %v39_v0, 0.0  ;;  %v42_v10 = vmul.f32 %v40_v7, %v39_v0  ;;  %v66_v24 = vld [vmem:[%s228_s2] sm:$0x1]  ;;  %s75_s10 = sshll.u32 %s166_s9, 4  ;;  %s76_s10 = int_to_ptr.vmem [resolvable:$true] %s75_s10 }
  0x27   :  { %s136_s11 = scalar_lea.vmem %s76_s10, 16  ;;  %s140_s12 = scalar_lea.vmem %s76_s10, 32 }
  0x28   :  { %v45_v2 = vsub.f32 0.0, %v44_v1  ;;  %v43_v14 = vsub.f32 %v41_v9, %v42_v10  ;;  %p137_p2 = scmp.ne.s32.totalorder %s76_s10, %s136_s11  ;;  %p141_p3 = scmp.lt.s32.totalorder %s76_s10, %s76_s10 }
  0x29   :  { %p142_p4 = scmp.lt.s32.totalorder %s140_s12, %s136_s11 }
  0x2a   :  { %v46_v3 = vmul.f32 1.442695, %v45_v2 }
  0x2b   :  { %p143_p5 = por %p142_p4, %p141_p3 }
  0x2c   :  { %88 = vpow2.f32 %v46_v3 }
  0x2d   :  { %p144_p6 = pnand %p143_p5, %p137_p2 }
  0x36   :  { %v89_v4 = vpop.eup %88 }
  0x37   :  { %v48_v5 = vadd.f32 1.0, %v89_v4  ;;  %v51_v6 = vmul.f32 -0.5, %v89_v4  ;;  %v54_v11 = vand.u32 2147483647, %v89_v4 }
  0x39   :  { %90 = vlog2.f32 %v48_v5  ;;  %v52_v8 = vadd.f32 1.0, %v51_v6  ;;  %vm55_vm0 = vcmp.lt.f32.partialorder %v54_v11, 0.0004427343 }
  0x3b   :  { %v53_v12 = vmul.f32 %v89_v4, %v52_v8 }
  0x43   :  { %v91_v13 = vpop.eup %90 }
  0x44   :  { %v50_v15 = vmul.f32 0.6931472, %v91_v13 }
  0x46   :  { %v56_v16 = vsel %vm55_vm0, %v53_v12, %v50_v15 }
  0x47   :  { %v57_v17 = vadd.f32 %v56_v16, %v43_v14 }
  0x49   :  { %v58_v18 = vrot.slane %v57_v17, 4 }
  0x4b   :  { %v59_v19 = vadd.f32 %v58_v18, %v57_v17 }
  0x4d   :  { %v60_v20 = vrot.slane %v59_v19, 2 }
  0x4f   :  { %v61_v21 = vadd.f32 %v60_v20, %v59_v19 }
  0x51   :  { %v62_v22 = vrot.slane %v61_v21, 1 }
  0x53   :  { %v63_v23 = vadd.f32 %v62_v22, %v61_v21 }
  0x55   :  { %v65_v25 = vmul.f32 0.125, %v63_v23 }
  0x57   :  { %v67_v26 = vmul.f32 %v66_v24, %v65_v25 }
  0x59   :  { %68 = vst [vmem:[#allocation7] sm:$0x1] %v67_v26 }
  0x5a   :  { %147 = shalt.err (!%p144_p6)
}
  0x5b   :  { %s148_s15 = scalar_lea.hbm %s229_s3, 16 }
  0x5c   :  { %p149_p7 = scmp.ne.s32.totalorder %s229_s3, %s148_s15  ;;  %p152_p8 = scmp.lt.u32.totalorder %s148_s15, %s229_s3 }
  0x5e   :  { %p154_p9 = pnand %p152_p8, %p149_p7 }
  0x60   :  { %157 = shalt.err (!%p154_p9)
}
  0x61   :  { %78 = dma.vmem_to_hbm [thread:$0]  %s76_s10, 16, %s229_s3, [#allocation4]  }
  0x62   :  { %162 = dma.done.wait [#allocation4], 16  }
  0x63   :  { %163 = vsyncadd [#allocation4], 4294967280 }
  0x64   :  { %82 = vsyncpa [#allocation3], 1 }
  0x65   :  { %83 = vsyncpa [#allocation6], 1 }
  0x66   :  { %84 = vsyncpa [#allocation4], 1 }

</bundles_post_ra>
